<compile_context>
chip_gen: v5e
topology: v5e:2x2
jax: 0.10.0
libtpu: 0.0.40
codegen_flags: <defaults>
</compile_context>

<pallas_src>
import functools

import jax
import jax.numpy as jnp
from jax import lax
from jax.experimental import pallas as pl
from jax.experimental.pallas import tpu as pltpu

_MB = 1024 * 1024
# lax.dot_general dims: contract on the in_features axis of both operands
# (PyTorch nn.Linear weights are (out_features, in_features)).
_DOT_T = (((1,), (1,)), ((), ()))


def _vmem_capacity_bytes():
    """Trace-time VMEM capacity query with a conservative fallback."""
    try:
        info = pltpu.get_tpu_info()
        cap = getattr(info, "vmem_capacity_bytes", None)
        if cap:
            return int(cap)
    except Exception:
        pass
    return 64 * _MB  # conservative default (v7x per-TC size)


# --------------------------------------------------------------------------
# Kernels
# --------------------------------------------------------------------------
def _make_fused_kernel(hw):
    """Single-pass SE kernel closed over the true spatial size."""
    inv_hw = 1.0 / float(hw)

    def kernel(x_ref, w1_ref, w2_ref, o_ref):
        # x_ref:  (TB, C, HW)  native dtype
        # w1_ref: (C//r, C)    fc1 weight (out_features, in_features)
        # w2_ref: (C, C//r)    fc2 weight (out_features, in_features)

        # ---- squeeze: global average pool, accumulate in f32 ----
        y = jnp.sum(x_ref[...], axis=-1, dtype=jnp.float32) * inv_hw     # (TB, C)

        # ---- excitation: fc1 -> ReLU -> fc2 -> sigmoid (tiny) ----
        h = jnp.maximum(
            lax.dot_general(y, w1_ref[...], _DOT_T,
                            preferred_element_type=jnp.float32), 0.0)    # (TB, C//r)
        s = jax.nn.sigmoid(
            lax.dot_general(h, w2_ref[...], _DOT_T,
                            preferred_element_type=jnp.float32))         # (TB, C)

        # ---- scale: re-read the slab (no multi-MiB value live across FCs) ----
        x = x_ref[...]
        o_ref[...] = (x * s[:, :, None].astype(x.dtype)).astype(o_ref.dtype)

    return kernel


def _make_pool_gate_kernel(hw, thw):
    """Pass 1 of the two-pass fallback: pooled mean + FC gate per batch elem."""
    inv_hw = 1.0 / float(hw)

    def kernel(x_ref, w1_ref, w2_ref, gate_ref, acc_ref):
        h = pl.program_id(1)

        @pl.when(h == 0)
        def _():
            acc_ref[...] = jnp.zeros_like(acc_ref)

        x = x_ref[...]                                          # (1, C, thw)
        # Mask out-of-range lanes of the final partial chunk.
        rem = hw - h * thw
        mask = lax.broadcasted_iota(jnp.int32, x.shape, 2) < rem
        acc_ref[...] += jnp.sum(jnp.where(mask, x, jnp.zeros_like(x)),
                                axis=-1, dtype=jnp.float32)     # (1, C)

        @pl.when(h == pl.num_programs(1) - 1)
        def _():
            y = acc_ref[...] * inv_hw                           # (1, C) f32
            t = jnp.maximum(
                lax.dot_general(y, w1_ref[...], _DOT_T,
                                preferred_element_type=jnp.float32), 0.0)
            s = jax.nn.sigmoid(
                lax.dot_general(t, w2_ref[...], _DOT_T,
                                preferred_element_type=jnp.float32))
            gate_ref[...] = s[:, :, None]                       # (1, C, 1) f32

    return kernel


def _scale_kernel(x_ref, gate_ref, o_ref):
    """Pass 2 of the two-pass fallback: broadcast channel gates over hw chunk."""
    x = x_ref[...]                                              # (1, C, thw)
    g = gate_ref[...].astype(x.dtype)                           # (1, C, 1)
    o_ref[...] = (x * g).astype(o_ref.dtype)


# --------------------------------------------------------------------------
# Wrapper
# --------------------------------------------------------------------------
def se_layer(x, w1, w2, *, force_two_pass=False):
    """SELayer forward.  x: (B, C, H, W); w1: (C//r, C); w2: (C, C//r)
    (PyTorch nn.Linear (out_features, in_features) layout, no bias)."""
    B, C, H, W = x.shape
    hw = H * W
    x_flat = x.reshape(B, C, hw)

    dtype_bytes = jnp.dtype(x.dtype).itemsize
    per_batch_bytes = C * hw * dtype_bytes
    w_bytes = (w1.size * jnp.dtype(w1.dtype).itemsize
               + w2.size * jnp.dtype(w2.dtype).itemsize)

    # ---- generation-aware budgets ------------------------------------------
    vmem_cap = _vmem_capacity_bytes()
    # Tile target ~1/6 of VMEM (capped at 12 MiB): double-buffered in + out
    # tiles stay well inside v7x's 64 MiB; v5e/v6e get the full 12 MiB.
    target_tile_bytes = int(min(12 * _MB, max(4 * _MB, vmem_cap // 6)))
    # Scoped-VMEM ceiling: ~7/8 of physical, never above 100 MiB, never < 32 MiB.
    vmem_cap_limit = max(min(100 * _MB, (vmem_cap * 7) // 8), 32 * _MB)
    # Largest per-step x tile the fused kernel can afford (4x buffered + weights).
    max_fused_tile = max((vmem_cap_limit - 4 * w_bytes - 4 * _MB) // 4, 0)

    def vmem_limit_for(tile_bytes, extra_bytes):
        needed = 4 * tile_bytes + extra_bytes + 2 * _MB
        return int(min(max(needed, 32 * _MB), vmem_cap_limit))

    if (not force_two_pass) and per_batch_bytes <= max_fused_tile:
        # ------------------------- fused single-pass path -------------------
        tb_cap = max(1, min(target_tile_bytes, max_fused_tile) // per_batch_bytes)
        divisors = [d for d in range(1, B + 1) if B % d == 0]
        feasible = [d for d in divisors if d <= tb_cap] or [1]
        tb = None
        for pred in (lambda g: g >= 4 and g % 2 == 0,   # even grid, >= 4 steps
                     lambda g: g >= 2 and g % 2 == 0,   # even grid
                     lambda g: g >= 2):                 # at least 2 steps
            cands = [d for d in feasible if pred(B // d)]
            if cands:
                tb = max(cands)
                break
        if tb is None:
            tb = max(feasible)
        grid_b = B // tb
        tile_bytes = tb * per_batch_bytes

        cost = pl.CostEstimate(
            flops=int(2 * B * C * hw + 4 * B * C * w1.shape[0]),
            transcendentals=int(B * C),
            bytes_accessed=int(2 * B * C * hw * dtype_bytes + w_bytes),
        )

        out = pl.pallas_call(
            _make_fused_kernel(hw),
            out_shape=jax.ShapeDtypeStruct((B, C, hw), x.dtype),
            grid_spec=pltpu.PrefetchScalarGridSpec(
                num_scalar_prefetch=0,
                grid=(grid_b,),
                in_specs=[
                    # Last-two block dims equal full array dims -> exempt from
                    # (8,128) rule; non-128-multiple hw uses masked stores.
                    pl.BlockSpec((tb, C, hw), lambda b: (b, 0, 0)),
                    pl.BlockSpec(w1.shape, lambda b: (0, 0)),
                    pl.BlockSpec(w2.shape, lambda b: (0, 0)),
                ],
                out_specs=pl.BlockSpec((tb, C, hw), lambda b: (b, 0, 0)),
            ),
            compiler_params=pltpu.CompilerParams(
                dimension_semantics=("parallel",),
                vmem_limit_bytes=vmem_limit_for(tile_bytes, 4 * w_bytes),
            ),
            cost_estimate=cost,
        )(x_flat, w1, w2)
        return out.reshape(B, C, H, W)

    # ------------------- two-pass fallback (huge C*H*W per batch) -----------
    # Pass 1 computes per-batch gates by accumulating over hw chunks; pass 2
    # streams the slab again and applies the gate.  ~1.5x HBM traffic, but it
    # never needs a full per-batch tile resident in VMEM.
    thw = max(128, (target_tile_bytes // max(C * dtype_bytes, 1)) // 128 * 128)
    if thw >= hw:
        thw = hw                      # single full-width chunk, no OOB lanes
    n_hw = -(-hw // thw)
    tile_bytes = C * thw * dtype_bytes

    gates = pl.pallas_call(
        _make_pool_gate_kernel(hw, thw),
        out_shape=jax.ShapeDtypeStruct((B, C, 1), jnp.float32),
        grid_spec=pltpu.PrefetchScalarGridSpec(
            num_scalar_prefetch=0,
            grid=(B, n_hw),
            in_specs=[
                pl.BlockSpec((1, C, thw), lambda b, h: (b, 0, h)),
                pl.BlockSpec(w1.shape, lambda b, h: (0, 0)),
                pl.BlockSpec(w2.shape, lambda b, h: (0, 0)),
            ],
            out_specs=pl.BlockSpec((1, C, 1), lambda b, h: (b, 0, 0)),
            scratch_shapes=[pltpu.VMEM((1, C), jnp.float32)],
        ),
        compiler_params=pltpu.CompilerParams(
            dimension_semantics=("parallel", "arbitrary"),
            vmem_limit_bytes=vmem_limit_for(tile_bytes, 4 * w_bytes),
        ),
        cost_estimate=pl.CostEstimate(
            flops=int(B * C * hw + 4 * B * C * w1.shape[0]),
            transcendentals=int(B * C),
            bytes_accessed=int(B * C * hw * dtype_bytes + w_bytes),
        ),
    )(x_flat, w1, w2)

    out = pl.pallas_call(
        _scale_kernel,
        out_shape=jax.ShapeDtypeStruct((B, C, hw), x.dtype),
        grid_spec=pltpu.PrefetchScalarGridSpec(
            num_scalar_prefetch=0,
            grid=(B, n_hw),
            in_specs=[
                pl.BlockSpec((1, C, thw), lambda b, h: (b, 0, h)),
                pl.BlockSpec((1, C, 1), lambda b, h: (b, 0, 0)),
            ],
            out_specs=pl.BlockSpec((1, C, thw), lambda b, h: (b, 0, h)),
        ),
        compiler_params=pltpu.CompilerParams(
            dimension_semantics=("parallel", "parallel"),
            vmem_limit_bytes=vmem_limit_for(tile_bytes, 4 * C * 4),
        ),
        cost_estimate=pl.CostEstimate(
            flops=int(B * C * hw),
            transcendentals=0,
            bytes_accessed=int(2 * B * C * hw * dtype_bytes + B * C * 4),
        ),
    )(x_flat, gates)
    return out.reshape(B, C, H, W)


# --------------------------------------------------------------------------
# Pure-JAX reference matching the PyTorch forward
# --------------------------------------------------------------------------
def se_layer_ref(x, w1, w2):
    y = jnp.mean(x, axis=(2, 3))                 # (B, C)
    y = jnp.maximum(y @ w1.T, 0.0)               # (B, C//r)
    y = jax.nn.sigmoid(y @ w2.T)                 # (B, C)
    return x * y[:, :, None, None]


if __name__ == "__main__":
    key = jax.random.PRNGKey(0)
    B, C, H, W = 2, 32, 16, 16
    reduction = 16
    Cr = C // reduction

    kx, k1, k2 = jax.random.split(key, 3)
    x = jax.random.normal(kx, (B, C, H, W), dtype=jnp.float32)
    # nn.Linear weights: (out_features, in_features), no bias
    w1 = jax.random.normal(k1, (Cr, C), dtype=jnp.float32) * 0.1
    w2 = jax.random.normal(k2, (C, Cr), dtype=jnp.float32) * 0.1

    ref = se_layer_ref(x, w1, w2)

    # Fused single-pass path (default).
    out = jax.jit(se_layer)(x, w1, w2)
    jax.block_until_ready(out)
    assert out.shape == (B, C, H, W)
    assert jnp.allclose(out, ref, atol=1e-5, rtol=1e-5), "fused path mismatch"

    # Non-128-multiple spatial size (exercises the no-pad masked-store path).
    x7 = jax.random.normal(kx, (B, C, 7, 7), dtype=jnp.float32)
    out7 = jax.jit(se_layer)(x7, w1, w2)
    jax.block_until_ready(out7)
    assert jnp.allclose(out7, se_layer_ref(x7, w1, w2), atol=1e-5, rtol=1e-5), \
        "fused path (hw=49) mismatch"

    # Two-pass fallback path (forced at small shapes to verify correctness).
    out2 = jax.jit(functools.partial(se_layer, force_two_pass=True))(x, w1, w2)
    jax.block_until_ready(out2)
    assert jnp.allclose(out2, ref, atol=1e-5, rtol=1e-5), "two-pass path mismatch"

    print("KERNEL_OK")
</pallas_src>

<mosaic_0001>
module attributes {stable_mosaic.version = 11 : i64} {
  func.func @kernel(%arg0: i32, %arg1: memref<1x32x256xf32, #tpu.memory_space<vmem>>, %arg2: memref<2x32xf32, #tpu.memory_space<vmem>>, %arg3: memref<32x2xf32, #tpu.memory_space<vmem>>, %arg4: memref<1x32x256xf32, #tpu.memory_space<vmem>>) attributes {dimension_semantics = [#tpu.dimension_semantics<parallel>], iteration_bounds = array<i64: 2>, scalar_prefetch = 0 : i64, scratch_operands = 0 : i64, tpu.core_type = #tpu.core_type<tc>, window_params = [{transform_indices = @transform_0, window_bounds = array<i64: 1, 32, 256>}, {pipeline_mode = #tpu.pipeline_mode<synchronous>, transform_indices = @transform_1, window_bounds = array<i64: 2, 32>}, {pipeline_mode = #tpu.pipeline_mode<synchronous>, transform_indices = @transform_2, window_bounds = array<i64: 32, 2>}, {transform_indices = @transform_3, window_bounds = array<i64: 1, 32, 256>}]} {
    %c0 = arith.constant 0 : index
    %c0_0 = arith.constant 0 : index
    %c0_1 = arith.constant 0 : index
    %0 = vector.load %arg1[%c0, %c0_0, %c0_1] : memref<1x32x256xf32, #tpu.memory_space<vmem>>, vector<1x32x256xf32>
    %cst = arith.constant dense<0.000000e+00> : vector<1x32xf32>
    %1 = vector.multi_reduction <add>, %0, %cst [2] : vector<1x32x256xf32> to vector<1x32xf32>
    %cst_2 = arith.constant 3.906250e-03 : f32
    %2 = vector.broadcast %cst_2 : f32 to vector<1x32xf32>
    %3 = arith.mulf %1, %2 : vector<1x32xf32>
    %c0_3 = arith.constant 0 : index
    %c0_4 = arith.constant 0 : index
    %4 = vector.load %arg2[%c0_3, %c0_4] : memref<2x32xf32, #tpu.memory_space<vmem>>, vector<2x32xf32>
    %cst_5 = arith.constant dense<0.000000e+00> : vector<1x2xf32>
    %5 = tpu.matmul %3, %4, %cst_5 {dimension_numbers = #tpu.dot_dimension_numbers<[1], [1], [0], [0], [0, 0, 1, 0], [], []>} : vector<1x32xf32>, vector<2x32xf32>, vector<1x2xf32> -> vector<1x2xf32>
    %cst_6 = arith.constant 0.000000e+00 : f32
    %6 = vector.broadcast %cst_6 : f32 to vector<1x2xf32>
    %7 = arith.maximumf %5, %6 : vector<1x2xf32>
    %c0_7 = arith.constant 0 : index
    %c0_8 = arith.constant 0 : index
    %8 = vector.load %arg3[%c0_7, %c0_8] : memref<32x2xf32, #tpu.memory_space<vmem>>, vector<32x2xf32>
    %cst_9 = arith.constant dense<0.000000e+00> : vector<1x32xf32>
    %9 = tpu.matmul %7, %8, %cst_9 {dimension_numbers = #tpu.dot_dimension_numbers<[1], [1], [0], [0], [0, 0, 1, 0], [], []>} : vector<1x2xf32>, vector<32x2xf32>, vector<1x32xf32> -> vector<1x32xf32>
    %10 = arith.negf %9 : vector<1x32xf32>
    %11 = math.exp %10 : vector<1x32xf32>
    %cst_10 = arith.constant 1.000000e+00 : f32
    %12 = vector.broadcast %cst_10 : f32 to vector<1x32xf32>
    %13 = arith.addf %12, %11 : vector<1x32xf32>
    %14 = arith.divf %12, %13 : vector<1x32xf32>
    %c0_11 = arith.constant 0 : index
    %c0_12 = arith.constant 0 : index
    %c0_13 = arith.constant 0 : index
    %15 = vector.load %arg1[%c0_11, %c0_12, %c0_13] : memref<1x32x256xf32, #tpu.memory_space<vmem>>, vector<1x32x256xf32>
    %16 = vector.shape_cast %14 : vector<1x32xf32> to vector<1x32x1xf32>
    %17 = vector.broadcast %16 : vector<1x32x1xf32> to vector<1x32x256xf32>
    %18 = arith.mulf %15, %17 : vector<1x32x256xf32>
    %c0_14 = arith.constant 0 : index
    %c0_15 = arith.constant 0 : index
    %c0_16 = arith.constant 0 : index
    %19 = vector.load %arg4[%c0_14, %c0_15, %c0_16] : memref<1x32x256xf32, #tpu.memory_space<vmem>>, vector<1x32x256xf32>
    tpu.vector_store %arg4[%c0_14, %c0_15, %c0_16], %18 {strides = array<i32>} : memref<1x32x256xf32, #tpu.memory_space<vmem>>, vector<1x32x256xf32>,
    return
  }
  func.func @transform_0(%arg0: i32) -> (i32, i32, i32) {
    %c0_i32 = arith.constant 0 : i32
    %c0_i32_0 = arith.constant 0 : i32
    %c0_i32_1 = arith.constant 0 : i32
    return %arg0, %c0_i32, %c0_i32_0 : i32, i32, i32
  }
  func.func @transform_1(%arg0: i32) -> (i32, i32) {
    %c0_i32 = arith.constant 0 : i32
    %c0_i32_0 = arith.constant 0 : i32
    %c0_i32_1 = arith.constant 0 : i32
    return %c0_i32, %c0_i32_0 : i32, i32
  }
  func.func @transform_2(%arg0: i32) -> (i32, i32) {
    %c0_i32 = arith.constant 0 : i32
    %c0_i32_0 = arith.constant 0 : i32
    %c0_i32_1 = arith.constant 0 : i32
    return %c0_i32, %c0_i32_0 : i32, i32
  }
  func.func @transform_3(%arg0: i32) -> (i32, i32, i32) {
    %c0_i32 = arith.constant 0 : i32
    %c0_i32_0 = arith.constant 0 : i32
    %c0_i32_1 = arith.constant 0 : i32
    return %arg0, %c0_i32, %c0_i32_0 : i32, i32, i32
  }
}

</mosaic_0001>

<bundles_post_ra>
// kernel: se_layer.1
= control target key start
LH: loop header
LB: loop body
LE: loop exit
PB: predicated region body
PF: predicated region fallthrough
CT: control target
= control target key end

     0   :  { %s463_s12 = smov 0   ;;  %s541_s0 = inlined_call_operand.vmem [shape: f32[2,32,256], index: 0, kind: input, shape index: {}]   ;;  %s542_s1 = inlined_call_operand.vmem [shape: f32[2,32], index: 1, kind: input, shape index: {}]   ;;  %s543_s2 = inlined_call_operand.vmem [shape: f32[32,2], index: 2, kind: input, shape index: {}]   ;;  %s544_s3 = inlined_call_operand.vmem [shape: f32[2,32,256], index: 3, kind: output, shape index: {}]  }
   0x1 LB: > { %s397_s13 = sadd.s32 4294967295, %s441_s12   ;;  %p401_p0 = scmp.ge.s32.totalorder %s441_s12, 1  ;;  %s441_s12 = sphi %s463_s12, %s13_s12  }
   0x2   : > { %p137_p1 = scmp.lt.s32.totalorder %s441_s12, 3 }
   0x4   : > { %p138_p2 = pnand %p401_p0, %p137_p1 }
   0x5   : > { %p161_p3 = scmp.lt.s32.totalorder (!%p138_p2), %s397_s13, 1 }
   0x6   : > { %141 = sbr.rel (%p138_p2) target bundleno = 553 (0x229), region = 32 }
   0xb   : > { %s546_s13 = smov (!%p161_p3, %s397_s13), 1  ;;  %v195_v12 = vld [vmem:[%s542_s1] sm:$0x3]  ;;  %vm215_vm0 = vcmask 261120   ;;  %v245_v13 = vld [vmem:[%s543_s2 + $0x18] sm:$0xff]  ;;  %vm246_vm1 = vcmask 15360   ;;  %v200_v16 = vlaneseq }
   0xc   : > { %s416_s14 = sshll.u32 %s546_s13, 6  ;;  %406 = vmatpush.xpose.msk.msra.mxu0 %vm215_vm0, %v195_v12  ;;  %408 = vmatpush.xpose.msk.msra.mxu1 %vm246_vm1, %v245_v13  ;;  %v244_v14 = vld [vmem:[%s543_s2 + $0x10] sm:$0xff]  ;;  %v243_v15 = vld [vmem:[%s543_s2 + $0x8] sm:$0xff]  ;;  %vm205_vm2 = vcmask 130112   ;;  %vm209_vm3 = vcmask 195712   ;;  %vm213_vm4 = vcmask 261312  }
   0xd   : > { %s165_s17 = scalar_lea.vmem %s541_s0, %s416_s14  ;;  %v201_v19 = vand.u32 127, %v200_v16  ;;  %v242_v36 = vld [vmem:[%s543_s2] sm:$0xff]  ;;  %v303_v39 = vshrl.u32 %v200_v16, 7  ;;  %s170_s30 = scalar_lea.vmem %s544_s3, %s416_s14 }
   0xe   : > { %v479_v0 = vld [vmem:[%s165_s17] sm:$0xff]  ;;  %v481_v1 = vld [vmem:[%s165_s17 + $0x8] sm:$0xff]  ;;  %v491_v6 = vld [vmem:[%s165_s17 + $0x10] sm:$0xff] }
   0xf   : > { %v483_v2 = vld [vmem:[%s165_s17 + $0x20] sm:$0xff]  ;;  %v179_v3 = vadd.f32 %v481_v1, %v479_v0  ;;  %v487_v4 = vld [vmem:[%s165_s17 + $0x28] sm:$0xff]  ;;  %v493_v7 = vld [vmem:[%s165_s17 + $0x18] sm:$0xff]  ;;  %v203_v21 = vadd.s32 4294967288, %v201_v19  ;;  %v207_v22 = vadd.s32 4294967280, %v201_v19  ;;  %v211_v25 = vadd.s32 4294967272, %v201_v19  ;;  %426 = vset.pattern.permute.xlu2 %v303_v39 }
  0x10   : > { %v185_v5 = vadd.f32 %v487_v4, %v483_v2  ;;  %v495_v8 = vld [vmem:[%s165_s17 + $0x30] sm:$0xff]  ;;  %v497_v9 = vld [vmem:[%s165_s17 + $0x38] sm:$0xff]  ;;  %v182_v10 = vadd.f32 %v493_v7, %v491_v6  ;;  %409 = vmatpush.xpose.msk.msra.mxu1 %vm246_vm1, %v244_v14  ;;  %v322_v40 = vadd.s32 24, %v303_v39  ;;  %v316_v41 = vadd.s32 16, %v303_v39 }
  0x11   : > { %180 = vadd.xlane.f32.xlu0 %v179_v3  ;;  %v188_v11 = vadd.f32 %v497_v9, %v495_v8  ;;  %v310_v57 = vadd.s32 8, %v303_v39 }
  0x12   : > { %186 = vadd.xlane.f32.xlu1 %v185_v5  ;;  %428 = vset.pattern.permute.xlu0 %v316_v41 }
  0x13   : > { %429 = vset.pattern.permute.xlu1 %v322_v40 }
  0x14   : > { %410 = vmatpush.xpose.msk.msra.mxu1 %vm246_vm1, %v243_v15 }
  0x18   : > { %411 = vmatpush.xpose.msk.msra.mxu1 %vm246_vm1, %v242_v36 }
  0x19   : > { %183 = vadd.xlane.f32.xlu0 %v182_v10 }
  0x1a   : > { %189 = vadd.xlane.f32.xlu1 %v188_v11 }
  0x84   : > { %v181_v17 = vpop.xlane.xlu0 %180 }
  0x85   : > { %v187_v18 = vpop.xlane.xlu1 %186  ;;  %v191_v20 = vmul.f32 0.00390625, %v181_v17 }
  0x86   : > { %v193_v23 = vmul.f32 0.00390625, %v187_v18 }
  0x87   : > { %v202_v29 = vperm.slane %v191_v20, %v201_v19 }
  0x88   : > { %v208_v31 = vperm.slane %v193_v23, %v207_v22 }
  0x8c   : > { %v184_v24 = vpop.xlane.xlu0 %183 }
  0x8d   : > { %v192_v26 = vmul.f32 0.00390625, %v184_v24  ;;  %v190_v27 = vpop.xlane.xlu1 %189 }
  0x8e   : > { %v194_v28 = vmul.f32 0.00390625, %v190_v27 }
  0x8f   : > { %v204_v30 = vperm.slane %v192_v26, %v203_v21 }
  0x90   : > { %v212_v32 = vperm.slane %v194_v28, %v211_v25 }
  0x91   : > { %v206_v33 = vsel %vm205_vm2, %v204_v30, %v202_v29 }
  0x92   : > { %v210_v34 = vsel %vm209_vm3, %v208_v31, %v206_v33 }
  0x93   : > { %v214_v35 = vsel %vm213_vm4, %v212_v32, %v210_v34 }
  0x94   : > { %407 = vmatmul.msk.f32.vlgmr.msra.gmra.mxu0 %vm215_vm0, %v214_v35 }
 0x111   : > { %v238_v37 = vpop.f32.mrf.mxu0 }
 0x112   : > { %v241_v38 = vmax.f32 %v238_v37, 0.0 }
 0x114   : > { %412 = vmatmul.msk.f32.vlgmr.msra.gmra.mxu1 %vm246_vm1, %v241_v38 }
 0x191   : > { %v279_v42 = vpop.f32.mrf.mxu1 }
 0x192   : > { %v413_v43 = vmul.f32 -1.442695, %v279_v42 }
 0x194   : > { %431 = vpow2.f32 %v413_v43 }
 0x19a   : > { %v432_v44 = vpop.eup %431 }
 0x19b   : > { %v285_v45 = vadd.f32 1.0, %v432_v44 }
 0x19d   : > { %433 = vrcp.f32 %v285_v45  ;;  %v297_v49 = vand.u32 2147483648, %v285_v45  ;;  %v295_v51 = vand.u32 2147483647, %v285_v45  ;;  %vm291_vm6 = vweird.f32 %v285_v45 }
 0x19f   : > { %v298_v53 = vor.u32 1.1754944e-38, %v297_v49  ;;  %vm296_vm8 = vcmp.eq.f32.partialorder %v295_v51, 8.507059e+37 }
 0x1a3   : > { %v434_v46 = vpop.eup %433 }
 0x1a4   : > { %v287_v47 = vmul.f32 %v434_v46, %v285_v45  ;;  %vm292_vm5 = vweird.f32 %v434_v46 }
 0x1a5   : > { %vm293_vm7 = vmor %vm291_vm6, %vm292_vm5 }
 0x1a6   : > { %v288_v48 = vsub.f32 1.0, %v287_v47 }
 0x1a8   : > { %v289_v50 = vmul.f32 %v434_v46, %v288_v48 }
 0x1aa   : > { %v290_v52 = vadd.f32 %v434_v46, %v289_v50 }
 0x1ac   : > { %v294_v54 = vsel %vm293_vm7, %v434_v46, %v290_v52 }
 0x1ad   : > { %v299_v55 = vsel %vm296_vm8, %v298_v53, %v294_v54 }
 0x1ae   : > { %v301_v56 = vperm.slane %v299_v55, 0 }
 0x1b0   : > { %324 = vperm.xlu1 %429, %v301_v56   ;;  %318 = vperm.xlu0 %428, %v301_v56  }
 0x1b1   : > { %306 = vperm.xlu2 %426, %v301_v56  }
 0x1b8   : > { %430 = vset.pattern.permute.xlu0 %v322_v40 }
 0x1b9   : > { %427 = vset.pattern.permute.xlu2 %v310_v57 }
 0x1c1   : > { %312 = vperm.xlu2 %427, %v301_v56  }
 0x20b   : > { %v307_v58 = vpop.permute.xlu2 %306 }
 0x20c   : > { %v326_v59 = vmul.f32 %v307_v58, %v479_v0  ;;  %v327_v60 = vmul.f32 %v307_v58, %v481_v1 }
 0x20e   : > { %334 = vst [vmem:[%s170_s30] sm:$0xff] %v326_v59 }
 0x20f   : > { %335 = vst [vmem:[%s170_s30 + $0x8] sm:$0xff] %v327_v60 }
 0x21b   : > { %v313_v61 = vpop.permute.xlu2 %312 }
 0x21c   : > { %v328_v62 = vmul.f32 %v313_v61, %v491_v6  ;;  %v329_v63 = vmul.f32 %v313_v61, %v493_v7 }
 0x21e   : > { %336 = vst [vmem:[%s170_s30 + $0x10] sm:$0xff] %v328_v62 }
 0x21f   : > { %337 = vst [vmem:[%s170_s30 + $0x18] sm:$0xff] %v329_v63 }
 0x222   : > { %v325_v3 = vpop.permute.xlu1 %324  ;;  %v319_v5 = vpop.permute.xlu0 %318 }
 0x223   : > { %v332_v10 = vmul.f32 %v325_v3, %v495_v8  ;;  %v333_v11 = vmul.f32 %v325_v3, %v497_v9  ;;  %v330_v12 = vmul.f32 %v319_v5, %v483_v2  ;;  %v331_v0 = vmul.f32 %v319_v5, %v487_v4 }
 0x225   : > { %340 = vst [vmem:[%s170_s30 + $0x30] sm:$0xff] %v332_v10 }
 0x226   : > { %341 = vst [vmem:[%s170_s30 + $0x38] sm:$0xff] %v333_v11 }
 0x227   : > { %338 = vst [vmem:[%s170_s30 + $0x20] sm:$0xff] %v330_v12 }
 0x228   : > { %339 = vst [vmem:[%s170_s30 + $0x28] sm:$0xff] %v331_v0 }
 0x229 PF: > { %s13_s12 = sadd.s32 1, %s441_s12  }
 0x22a   : > { %p10_p4 = scmp.ge.s32.totalorder %s13_s12, 4  }
 0x22c   :  { %12 = sbr.rel (!%p10_p4) target bundleno = 1 (0x1), region = 62 }

</bundles_post_ra>
